<compile_context>
chip_gen: v7x
topology: tpu7x:2x2x1
jax: 0.10.0
libtpu: 0.0.40
codegen_flags: <defaults>
</compile_context>

<pallas_src>
import functools
import math

import jax
import jax.numpy as jnp
from jax import lax
from jax.experimental import pallas as pl
from jax.experimental.pallas import tpu as pltpu


def _round_up(x, m):
    return (x + m - 1) // m * m


def _adl_kernel(log_alpha, alpha_pow_N, one_m_alpha, n_valid, tile_n, num_classes,
                x_ref, lab_ref, state_ref, out_ref,
                s1, s2, s3, s4, s5, s6):
    i = pl.program_id(0)

    @pl.when(i == 0)
    def _init():
        z = jnp.zeros((1, num_classes), jnp.float32)
        s1[...] = z
        s2[...] = z
        s3[...] = z
        s4[...] = z
        s5[...] = z
        s6[...] = z

    # Per-row geometric decay weight alpha**(N-1-row); zero for padded rows.
    row = lax.broadcasted_iota(jnp.int32, (tile_n, 1), 0) + i * tile_n
    valid = (row < n_valid).astype(jnp.float32)
    expo = jnp.maximum((n_valid - 1 - row).astype(jnp.float32), 0.0)
    a = jnp.exp(log_alpha * expo) * valid                      # (tile_n, 1)

    x = x_ref[...].astype(jnp.float32)                         # (tile_n, C)
    cls = lax.broadcasted_iota(jnp.int32, (tile_n, num_classes), 1)
    oh = (cls == lab_ref[...]).astype(jnp.float32)             # one-hot in-kernel

    # Reused products (algebraic reuse: "other" terms derived by subtraction).
    xa = x * a
    oh_xa = oh * xa

    s1[...] += jnp.sum(oh_xa, axis=0, keepdims=True)           # sum a*oh*x
    s2[...] += jnp.sum(xa, axis=0, keepdims=True)              # sum a*x
    s3[...] += jnp.sum(x * oh_xa, axis=0, keepdims=True)       # sum a*oh*x^2
    s4[...] += jnp.sum(x * xa, axis=0, keepdims=True)          # sum a*x^2
    s5[...] += jnp.sum(oh * a, axis=0, keepdims=True)          # sum a*oh
    s6[...] += jnp.sum(a, axis=0, keepdims=True)               # sum a (bcast to C)

    @pl.when(i == pl.num_programs(0) - 1)
    def _finalize():
        S1, S2, S3 = s1[...], s2[...], s3[...]
        S4, S5, S6 = s4[...], s5[...], s6[...]
        st = state_ref[...]                                    # (8, C) prior state

        mu = st[0:1, :] * alpha_pow_N + one_m_alpha * S1
        hmu = st[1:2, :] * alpha_pow_N + one_m_alpha * (S2 - S1)
        muT = st[2:3, :] * alpha_pow_N + one_m_alpha * S2

        # expanded-square scatters (no second pass over x needed)
        sw_own = S3 - 2.0 * mu * S1 + mu * mu * S5
        sw_oth = (S4 - S3) - 2.0 * hmu * (S2 - S1) + hmu * hmu * (S6 - S5)
        sW = st[3:4, :] * alpha_pow_N + one_m_alpha * (sw_own + sw_oth)

        sT = st[4:5, :] * alpha_pow_N + one_m_alpha * (S4 - 2.0 * muT * S2 + muT * muT * S6)
        sT = jnp.maximum(sT, 1e-8)   # clamp BEFORE store, as in the PyTorch module

        g = jnp.sum(sW / sT)
        g_row = jnp.full((1, num_classes), g, dtype=jnp.float32)
        pad = jnp.zeros((2, num_classes), jnp.float32)
        out_ref[...] = jnp.concatenate([mu, hmu, muT, sW, sT, g_row, pad], axis=0)


def adaptive_discriminant_loss(inputs, labels, state, alpha=0.9):
    """inputs: (N, C) float, labels: (N,) int, state: dict of 5 (C,) f32.

    Returns (G, new_state) — new_state mirrors the training-mode buffer update.
    """
    N, C = inputs.shape
    labels = labels.astype(jnp.int32).reshape(N, 1)

    # Row-tile size: big enough to amortize per-step overhead, 8-aligned,
    # small enough that 2 double-buffered tiles stay far under the v7x scoped
    # VMEM default even for wide C.
    tile_n = min(512, _round_up(N, 8))
    n_pad = _round_up(N, tile_n)
    num_tiles = n_pad // tile_n

    if n_pad != N:
        inputs = jnp.pad(inputs, ((0, n_pad - N), (0, 0)))
        labels = jnp.pad(labels, ((0, n_pad - N), (0, 0)))

    # Pack the five (C,) state vectors into one (8, C) slab (rows 5..7 unused).
    packed_state = jnp.concatenate(
        [state[k].reshape(1, C).astype(jnp.float32)
         for k in ("mu_k", "hat_mu_k", "mu_T_k", "sigma_W", "sigma_T")]
        + [jnp.zeros((3, C), jnp.float32)],
        axis=0)

    alpha = float(alpha)
    kernel = functools.partial(
        _adl_kernel,
        math.log(alpha),          # log_alpha
        alpha ** N,               # alpha**N
        1.0 - alpha,              # (1 - alpha)
        N, tile_n, C)

    packed_out = pl.pallas_call(
        kernel,
        out_shape=jax.ShapeDtypeStruct((8, C), jnp.float32),
        grid_spec=pltpu.PrefetchScalarGridSpec(
            num_scalar_prefetch=0,
            grid=(num_tiles,),
            in_specs=[
                pl.BlockSpec((tile_n, C), lambda i: (i, 0)),   # x tiles (streamed)
                pl.BlockSpec((tile_n, 1), lambda i: (i, 0)),   # labels column
                pl.BlockSpec((8, C), lambda i: (0, 0)),        # packed prior state
            ],
            out_specs=pl.BlockSpec((8, C), lambda i: (0, 0)),  # packed new state + G
            scratch_shapes=[pltpu.VMEM((1, C), jnp.float32)] * 6,
        ),
        input_output_aliases={2: 0},   # state slab aliased in-place
        compiler_params=pltpu.CompilerParams(
            dimension_semantics=("arbitrary",)),
    )(inputs, labels, packed_state)

    g = packed_out[5, 0]
    new_state = {
        "mu_k": packed_out[0],
        "hat_mu_k": packed_out[1],
        "mu_T_k": packed_out[2],
        "sigma_W": packed_out[3],
        "sigma_T": packed_out[4],
    }
    return g, new_state


def _reference(inputs, labels, state, alpha=0.9):
    """Pure-JAX reference mirroring the PyTorch forward (two-pass form)."""
    N, C = inputs.shape
    x = inputs.astype(jnp.float32)
    one_hot = jax.nn.one_hot(labels, C, dtype=jnp.float32)
    other = 1.0 - one_hot
    a = (alpha ** jnp.arange(N - 1, -1, -1, dtype=jnp.float32)).reshape(N, 1)
    aN = alpha ** N

    mu = state["mu_k"] * aN + (1 - alpha) * jnp.sum(x * one_hot * a, 0)
    hmu = state["hat_mu_k"] * aN + (1 - alpha) * jnp.sum(x * other * a, 0)
    muT = state["mu_T_k"] * aN + (1 - alpha) * jnp.sum(x * a, 0)
    sW = one_hot * (x - mu) ** 2 + other * (x - hmu) ** 2
    sW = state["sigma_W"] * aN + (1 - alpha) * jnp.sum(sW * a, 0)
    sT = state["sigma_T"] * aN + (1 - alpha) * jnp.sum((x - muT) ** 2 * a, 0)
    sT = jnp.maximum(sT, 1e-8)
    G = jnp.sum(sW / sT)
    new_state = {"mu_k": mu, "hat_mu_k": hmu, "mu_T_k": muT,
                 "sigma_W": sW, "sigma_T": sT}
    return G, new_state


if __name__ == "__main__":
    num_classes = 4
    N = 8
    alpha = 0.9

    key = jax.random.PRNGKey(0)
    k1, k2 = jax.random.split(key)
    inputs = jax.random.normal(k1, (N, num_classes), dtype=jnp.float32)
    labels = jax.random.randint(k2, (N,), 0, num_classes, dtype=jnp.int32)

    # module __init__: all running-state buffers start at zero
    state = {k: jnp.zeros((num_classes,), jnp.float32)
             for k in ("mu_k", "hat_mu_k", "mu_T_k", "sigma_W", "sigma_T")}

    g, new_state = adaptive_discriminant_loss(inputs, labels, state, alpha=alpha)
    g = jax.block_until_ready(g)

    g_ref, state_ref = _reference(inputs, labels, state, alpha=alpha)
    assert jnp.allclose(g, g_ref, rtol=1e-4, atol=1e-5), (g, g_ref)
    for k in state_ref:
        assert jnp.allclose(new_state[k], state_ref[k], rtol=1e-4, atol=1e-5), (
            k, new_state[k], state_ref[k])

    print("KERNEL_OK")
</pallas_src>

<mosaic_0001>
module attributes {stable_mosaic.version = 11 : i64} {
  func.func @_adl_kernel(%arg0: i32, %arg1: memref<8x4xf32, #tpu.memory_space<vmem>>, %arg2: memref<8x1xi32, #tpu.memory_space<vmem>>, %arg3: memref<8x4xf32, #tpu.memory_space<vmem>>, %arg4: memref<8x4xf32, #tpu.memory_space<vmem>>, %arg5: memref<1x4xf32, #tpu.memory_space<vmem>>, %arg6: memref<1x4xf32, #tpu.memory_space<vmem>>, %arg7: memref<1x4xf32, #tpu.memory_space<vmem>>, %arg8: memref<1x4xf32, #tpu.memory_space<vmem>>, %arg9: memref<1x4xf32, #tpu.memory_space<vmem>>, %arg10: memref<1x4xf32, #tpu.memory_space<vmem>>) attributes {dimension_semantics = [#tpu.dimension_semantics<arbitrary>], iteration_bounds = array<i64: 1>, scalar_prefetch = 0 : i64, scratch_operands = 6 : i64, tpu.core_type = #tpu.core_type<tc>, window_params = [{transform_indices = @transform_0, window_bounds = array<i64: 8, 4>}, {transform_indices = @transform_1, window_bounds = array<i64: 8, 1>}, {pipeline_mode = #tpu.pipeline_mode<synchronous>, transform_indices = @transform_2, window_bounds = array<i64: 8, 4>}, {pipeline_mode = #tpu.pipeline_mode<synchronous>, transform_indices = @transform_3, window_bounds = array<i64: 8, 4>}]} {
    %c0_i32 = arith.constant 0 : i32
    %0 = arith.cmpi eq, %arg0, %c0_i32 : i32
    %1 = arith.extui %0 : i1 to i32
    %c0_i32_0 = arith.constant 0 : i32
    %2 = arith.cmpi ne, %1, %c0_i32_0 : i32
    scf.if %2 {
      %cst_38 = arith.constant 0.000000e+00 : f32
      %68 = vector.broadcast %cst_38 : f32 to vector<1x4xf32>
      %c0_39 = arith.constant 0 : index
      %c0_40 = arith.constant 0 : index
      %69 = vector.load %arg5[%c0_39, %c0_40] : memref<1x4xf32, #tpu.memory_space<vmem>>, vector<1x4xf32>
      tpu.vector_store %arg5[%c0_39, %c0_40], %68 {strides = array<i32>} : memref<1x4xf32, #tpu.memory_space<vmem>>, vector<1x4xf32>,
      %c0_41 = arith.constant 0 : index
      %c0_42 = arith.constant 0 : index
      %70 = vector.load %arg6[%c0_41, %c0_42] : memref<1x4xf32, #tpu.memory_space<vmem>>, vector<1x4xf32>
      tpu.vector_store %arg6[%c0_41, %c0_42], %68 {strides = array<i32>} : memref<1x4xf32, #tpu.memory_space<vmem>>, vector<1x4xf32>,
      %c0_43 = arith.constant 0 : index
      %c0_44 = arith.constant 0 : index
      %71 = vector.load %arg7[%c0_43, %c0_44] : memref<1x4xf32, #tpu.memory_space<vmem>>, vector<1x4xf32>
      tpu.vector_store %arg7[%c0_43, %c0_44], %68 {strides = array<i32>} : memref<1x4xf32, #tpu.memory_space<vmem>>, vector<1x4xf32>,
      %c0_45 = arith.constant 0 : index
      %c0_46 = arith.constant 0 : index
      %72 = vector.load %arg8[%c0_45, %c0_46] : memref<1x4xf32, #tpu.memory_space<vmem>>, vector<1x4xf32>
      tpu.vector_store %arg8[%c0_45, %c0_46], %68 {strides = array<i32>} : memref<1x4xf32, #tpu.memory_space<vmem>>, vector<1x4xf32>,
      %c0_47 = arith.constant 0 : index
      %c0_48 = arith.constant 0 : index
      %73 = vector.load %arg9[%c0_47, %c0_48] : memref<1x4xf32, #tpu.memory_space<vmem>>, vector<1x4xf32>
      tpu.vector_store %arg9[%c0_47, %c0_48], %68 {strides = array<i32>} : memref<1x4xf32, #tpu.memory_space<vmem>>, vector<1x4xf32>,
      %c0_49 = arith.constant 0 : index
      %c0_50 = arith.constant 0 : index
      %74 = vector.load %arg10[%c0_49, %c0_50] : memref<1x4xf32, #tpu.memory_space<vmem>>, vector<1x4xf32>
      tpu.vector_store %arg10[%c0_49, %c0_50], %68 {strides = array<i32>} : memref<1x4xf32, #tpu.memory_space<vmem>>, vector<1x4xf32>,
    } else {
    }
    %3 = tpu.iota {dimensions = array<i32: 0>} : vector<8x1xi32>
    %c8_i32 = arith.constant 8 : i32
    %4 = arith.muli %arg0, %c8_i32 : i32
    %5 = vector.broadcast %4 : i32 to vector<8x1xi32>
    %6 = arith.addi %3, %5 : vector<8x1xi32>
    %c8_i32_1 = arith.constant 8 : i32
    %7 = vector.broadcast %c8_i32_1 : i32 to vector<8x1xi32>
    %8 = arith.cmpi slt, %6, %7 : vector<8x1xi32>
    %9 = arith.extui %8 : vector<8x1xi1> to vector<8x1xi32>
    %10 = arith.sitofp %9 : vector<8x1xi32> to vector<8x1xf32>
    %c7_i32 = arith.constant 7 : i32
    %11 = vector.broadcast %c7_i32 : i32 to vector<8x1xi32>
    %12 = arith.subi %11, %6 : vector<8x1xi32>
    %13 = arith.sitofp %12 : vector<8x1xi32> to vector<8x1xf32>
    %cst = arith.constant 0.000000e+00 : f32
    %14 = vector.broadcast %cst : f32 to vector<8x1xf32>
    %15 = arith.maximumf %13, %14 : vector<8x1xf32>
    %cst_2 = arith.constant -0.105360515 : f32
    %16 = vector.broadcast %cst_2 : f32 to vector<8x1xf32>
    %17 = arith.mulf %16, %15 : vector<8x1xf32>
    %18 = math.exp %17 : vector<8x1xf32>
    %19 = arith.mulf %18, %10 : vector<8x1xf32>
    %c0 = arith.constant 0 : index
    %c0_3 = arith.constant 0 : index
    %20 = vector.load %arg1[%c0, %c0_3] : memref<8x4xf32, #tpu.memory_space<vmem>>, vector<8x4xf32>
    %21 = tpu.iota {dimensions = array<i32: 1>} : vector<8x4xi32>
    %c0_4 = arith.constant 0 : index
    %c0_5 = arith.constant 0 : index
    %22 = vector.load %arg2[%c0_4, %c0_5] : memref<8x1xi32, #tpu.memory_space<vmem>>, vector<8x1xi32>
    %23 = vector.broadcast %22 : vector<8x1xi32> to vector<8x4xi32>
    %24 = arith.cmpi eq, %21, %23 : vector<8x4xi32>
    %25 = arith.extui %24 : vector<8x4xi1> to vector<8x4xi32>
    %26 = arith.sitofp %25 : vector<8x4xi32> to vector<8x4xf32>
    %27 = vector.broadcast %19 : vector<8x1xf32> to vector<8x4xf32>
    %28 = arith.mulf %20, %27 : vector<8x4xf32>
    %29 = arith.mulf %26, %28 : vector<8x4xf32>
    %c0_6 = arith.constant 0 : index
    %c0_7 = arith.constant 0 : index
    %30 = vector.load %arg5[%c0_6, %c0_7] : memref<1x4xf32, #tpu.memory_space<vmem>>, vector<1x4xf32>
    %cst_8 = arith.constant dense<0.000000e+00> : vector<4xf32>
    %31 = vector.multi_reduction <add>, %29, %cst_8 [0] : vector<8x4xf32> to vector<4xf32>
    %32 = vector.shape_cast %31 : vector<4xf32> to vector<1x4xf32>
    %33 = arith.addf %30, %32 : vector<1x4xf32>
    %c0_9 = arith.constant 0 : index
    %c0_10 = arith.constant 0 : index
    %34 = vector.load %arg5[%c0_9, %c0_10] : memref<1x4xf32, #tpu.memory_space<vmem>>, vector<1x4xf32>
    tpu.vector_store %arg5[%c0_9, %c0_10], %33 {strides = array<i32>} : memref<1x4xf32, #tpu.memory_space<vmem>>, vector<1x4xf32>,
    %c0_11 = arith.constant 0 : index
    %c0_12 = arith.constant 0 : index
    %35 = vector.load %arg6[%c0_11, %c0_12] : memref<1x4xf32, #tpu.memory_space<vmem>>, vector<1x4xf32>
    %cst_13 = arith.constant dense<0.000000e+00> : vector<4xf32>
    %36 = vector.multi_reduction <add>, %28, %cst_13 [0] : vector<8x4xf32> to vector<4xf32>
    %37 = vector.shape_cast %36 : vector<4xf32> to vector<1x4xf32>
    %38 = arith.addf %35, %37 : vector<1x4xf32>
    %c0_14 = arith.constant 0 : index
    %c0_15 = arith.constant 0 : index
    %39 = vector.load %arg6[%c0_14, %c0_15] : memref<1x4xf32, #tpu.memory_space<vmem>>, vector<1x4xf32>
    tpu.vector_store %arg6[%c0_14, %c0_15], %38 {strides = array<i32>} : memref<1x4xf32, #tpu.memory_space<vmem>>, vector<1x4xf32>,
    %c0_16 = arith.constant 0 : index
    %c0_17 = arith.constant 0 : index
    %40 = vector.load %arg7[%c0_16, %c0_17] : memref<1x4xf32, #tpu.memory_space<vmem>>, vector<1x4xf32>
    %41 = arith.mulf %20, %29 : vector<8x4xf32>
    %cst_18 = arith.constant dense<0.000000e+00> : vector<4xf32>
    %42 = vector.multi_reduction <add>, %41, %cst_18 [0] : vector<8x4xf32> to vector<4xf32>
    %43 = vector.shape_cast %42 : vector<4xf32> to vector<1x4xf32>
    %44 = arith.addf %40, %43 : vector<1x4xf32>
    %c0_19 = arith.constant 0 : index
    %c0_20 = arith.constant 0 : index
    %45 = vector.load %arg7[%c0_19, %c0_20] : memref<1x4xf32, #tpu.memory_space<vmem>>, vector<1x4xf32>
    tpu.vector_store %arg7[%c0_19, %c0_20], %44 {strides = array<i32>} : memref<1x4xf32, #tpu.memory_space<vmem>>, vector<1x4xf32>,
    %c0_21 = arith.constant 0 : index
    %c0_22 = arith.constant 0 : index
    %46 = vector.load %arg8[%c0_21, %c0_22] : memref<1x4xf32, #tpu.memory_space<vmem>>, vector<1x4xf32>
    %47 = arith.mulf %20, %28 : vector<8x4xf32>
    %cst_23 = arith.constant dense<0.000000e+00> : vector<4xf32>
    %48 = vector.multi_reduction <add>, %47, %cst_23 [0] : vector<8x4xf32> to vector<4xf32>
    %49 = vector.shape_cast %48 : vector<4xf32> to vector<1x4xf32>
    %50 = arith.addf %46, %49 : vector<1x4xf32>
    %c0_24 = arith.constant 0 : index
    %c0_25 = arith.constant 0 : index
    %51 = vector.load %arg8[%c0_24, %c0_25] : memref<1x4xf32, #tpu.memory_space<vmem>>, vector<1x4xf32>
    tpu.vector_store %arg8[%c0_24, %c0_25], %50 {strides = array<i32>} : memref<1x4xf32, #tpu.memory_space<vmem>>, vector<1x4xf32>,
    %c0_26 = arith.constant 0 : index
    %c0_27 = arith.constant 0 : index
    %52 = vector.load %arg9[%c0_26, %c0_27] : memref<1x4xf32, #tpu.memory_space<vmem>>, vector<1x4xf32>
    %53 = vector.broadcast %19 : vector<8x1xf32> to vector<8x4xf32>
    %54 = arith.mulf %26, %53 : vector<8x4xf32>
    %cst_28 = arith.constant dense<0.000000e+00> : vector<4xf32>
    %55 = vector.multi_reduction <add>, %54, %cst_28 [0] : vector<8x4xf32> to vector<4xf32>
    %56 = vector.shape_cast %55 : vector<4xf32> to vector<1x4xf32>
    %57 = arith.addf %52, %56 : vector<1x4xf32>
    %c0_29 = arith.constant 0 : index
    %c0_30 = arith.constant 0 : index
    %58 = vector.load %arg9[%c0_29, %c0_30] : memref<1x4xf32, #tpu.memory_space<vmem>>, vector<1x4xf32>
    tpu.vector_store %arg9[%c0_29, %c0_30], %57 {strides = array<i32>} : memref<1x4xf32, #tpu.memory_space<vmem>>, vector<1x4xf32>,
    %c0_31 = arith.constant 0 : index
    %c0_32 = arith.constant 0 : index
    %59 = vector.load %arg10[%c0_31, %c0_32] : memref<1x4xf32, #tpu.memory_space<vmem>>, vector<1x4xf32>
    %cst_33 = arith.constant dense<0.000000e+00> : vector<1xf32>
    %60 = vector.multi_reduction <add>, %19, %cst_33 [0] : vector<8x1xf32> to vector<1xf32>
    %61 = vector.shape_cast %60 : vector<1xf32> to vector<1x1xf32>
    %62 = vector.broadcast %61 : vector<1x1xf32> to vector<1x4xf32>
    %63 = arith.addf %59, %62 : vector<1x4xf32>
    %c0_34 = arith.constant 0 : index
    %c0_35 = arith.constant 0 : index
    %64 = vector.load %arg10[%c0_34, %c0_35] : memref<1x4xf32, #tpu.memory_space<vmem>>, vector<1x4xf32>
    tpu.vector_store %arg10[%c0_34, %c0_35], %63 {strides = array<i32>} : memref<1x4xf32, #tpu.memory_space<vmem>>, vector<1x4xf32>,
    %c0_i32_36 = arith.constant 0 : i32
    %65 = arith.cmpi eq, %arg0, %c0_i32_36 : i32
    %66 = arith.extui %65 : i1 to i32
    %c0_i32_37 = arith.constant 0 : i32
    %67 = arith.cmpi ne, %66, %c0_i32_37 : i32
    scf.if %67 {
      %c0_38 = arith.constant 0 : index
      %c0_39 = arith.constant 0 : index
      %68 = vector.load %arg5[%c0_38, %c0_39] : memref<1x4xf32, #tpu.memory_space<vmem>>, vector<1x4xf32>
      %c0_40 = arith.constant 0 : index
      %c0_41 = arith.constant 0 : index
      %69 = vector.load %arg6[%c0_40, %c0_41] : memref<1x4xf32, #tpu.memory_space<vmem>>, vector<1x4xf32>
      %c0_42 = arith.constant 0 : index
      %c0_43 = arith.constant 0 : index
      %70 = vector.load %arg7[%c0_42, %c0_43] : memref<1x4xf32, #tpu.memory_space<vmem>>, vector<1x4xf32>
      %c0_44 = arith.constant 0 : index
      %c0_45 = arith.constant 0 : index
      %71 = vector.load %arg8[%c0_44, %c0_45] : memref<1x4xf32, #tpu.memory_space<vmem>>, vector<1x4xf32>
      %c0_46 = arith.constant 0 : index
      %c0_47 = arith.constant 0 : index
      %72 = vector.load %arg9[%c0_46, %c0_47] : memref<1x4xf32, #tpu.memory_space<vmem>>, vector<1x4xf32>
      %c0_48 = arith.constant 0 : index
      %c0_49 = arith.constant 0 : index
      %73 = vector.load %arg10[%c0_48, %c0_49] : memref<1x4xf32, #tpu.memory_space<vmem>>, vector<1x4xf32>
      %c0_50 = arith.constant 0 : index
      %c0_51 = arith.constant 0 : index
      %74 = vector.load %arg3[%c0_50, %c0_51] : memref<8x4xf32, #tpu.memory_space<vmem>>, vector<8x4xf32>
      %75 = vector.extract_strided_slice %74 {offsets = [0, 0], sizes = [1, 4], strides = [1, 1]} : vector<8x4xf32> to vector<1x4xf32>
      %cst_52 = arith.constant 0.430467218 : f32
      %76 = vector.broadcast %cst_52 : f32 to vector<1x4xf32>
      %77 = arith.mulf %75, %76 : vector<1x4xf32>
      %cst_53 = arith.constant 1.000000e-01 : f32
      %78 = vector.broadcast %cst_53 : f32 to vector<1x4xf32>
      %79 = arith.mulf %78, %68 : vector<1x4xf32>
      %80 = arith.addf %77, %79 : vector<1x4xf32>
      %81 = vector.extract_strided_slice %74 {offsets = [1, 0], sizes = [1, 4], strides = [1, 1]} : vector<8x4xf32> to vector<1x4xf32>
      %cst_54 = arith.constant 0.430467218 : f32
      %82 = vector.broadcast %cst_54 : f32 to vector<1x4xf32>
      %83 = arith.mulf %81, %82 : vector<1x4xf32>
      %84 = arith.subf %69, %68 : vector<1x4xf32>
      %cst_55 = arith.constant 1.000000e-01 : f32
      %85 = vector.broadcast %cst_55 : f32 to vector<1x4xf32>
      %86 = arith.mulf %85, %84 : vector<1x4xf32>
      %87 = arith.addf %83, %86 : vector<1x4xf32>
      %88 = vector.extract_strided_slice %74 {offsets = [2, 0], sizes = [1, 4], strides = [1, 1]} : vector<8x4xf32> to vector<1x4xf32>
      %cst_56 = arith.constant 0.430467218 : f32
      %89 = vector.broadcast %cst_56 : f32 to vector<1x4xf32>
      %90 = arith.mulf %88, %89 : vector<1x4xf32>
      %cst_57 = arith.constant 1.000000e-01 : f32
      %91 = vector.broadcast %cst_57 : f32 to vector<1x4xf32>
      %92 = arith.mulf %91, %69 : vector<1x4xf32>
      %93 = arith.addf %90, %92 : vector<1x4xf32>
      %cst_58 = arith.constant 2.000000e+00 : f32
      %94 = vector.broadcast %cst_58 : f32 to vector<1x4xf32>
      %95 = arith.mulf %94, %80 : vector<1x4xf32>
      %96 = arith.mulf %95, %68 : vector<1x4xf32>
      %97 = arith.subf %70, %96 : vector<1x4xf32>
      %98 = arith.mulf %80, %80 : vector<1x4xf32>
      %99 = arith.mulf %98, %72 : vector<1x4xf32>
      %100 = arith.addf %97, %99 : vector<1x4xf32>
      %101 = arith.subf %71, %70 : vector<1x4xf32>
      %cst_59 = arith.constant 2.000000e+00 : f32
      %102 = vector.broadcast %cst_59 : f32 to vector<1x4xf32>
      %103 = arith.mulf %102, %87 : vector<1x4xf32>
      %104 = arith.subf %69, %68 : vector<1x4xf32>
      %105 = arith.mulf %103, %104 : vector<1x4xf32>
      %106 = arith.subf %101, %105 : vector<1x4xf32>
      %107 = arith.mulf %87, %87 : vector<1x4xf32>
      %108 = arith.subf %73, %72 : vector<1x4xf32>
      %109 = arith.mulf %107, %108 : vector<1x4xf32>
      %110 = arith.addf %106, %109 : vector<1x4xf32>
      %111 = vector.extract_strided_slice %74 {offsets = [3, 0], sizes = [1, 4], strides = [1, 1]} : vector<8x4xf32> to vector<1x4xf32>
      %cst_60 = arith.constant 0.430467218 : f32
      %112 = vector.broadcast %cst_60 : f32 to vector<1x4xf32>
      %113 = arith.mulf %111, %112 : vector<1x4xf32>
      %114 = arith.addf %100, %110 : vector<1x4xf32>
      %cst_61 = arith.constant 1.000000e-01 : f32
      %115 = vector.broadcast %cst_61 : f32 to vector<1x4xf32>
      %116 = arith.mulf %115, %114 : vector<1x4xf32>
      %117 = arith.addf %113, %116 : vector<1x4xf32>
      %118 = vector.extract_strided_slice %74 {offsets = [4, 0], sizes = [1, 4], strides = [1, 1]} : vector<8x4xf32> to vector<1x4xf32>
      %cst_62 = arith.constant 0.430467218 : f32
      %119 = vector.broadcast %cst_62 : f32 to vector<1x4xf32>
      %120 = arith.mulf %118, %119 : vector<1x4xf32>
      %cst_63 = arith.constant 2.000000e+00 : f32
      %121 = vector.broadcast %cst_63 : f32 to vector<1x4xf32>
      %122 = arith.mulf %121, %93 : vector<1x4xf32>
      %123 = arith.mulf %122, %69 : vector<1x4xf32>
      %124 = arith.subf %71, %123 : vector<1x4xf32>
      %125 = arith.mulf %93, %93 : vector<1x4xf32>
      %126 = arith.mulf %125, %73 : vector<1x4xf32>
      %127 = arith.addf %124, %126 : vector<1x4xf32>
      %cst_64 = arith.constant 1.000000e-01 : f32
      %128 = vector.broadcast %cst_64 : f32 to vector<1x4xf32>
      %129 = arith.mulf %128, %127 : vector<1x4xf32>
      %130 = arith.addf %120, %129 : vector<1x4xf32>
      %cst_65 = arith.constant 9.99999993E-9 : f32
      %131 = vector.broadcast %cst_65 : f32 to vector<1x4xf32>
      %132 = arith.maximumf %130, %131 : vector<1x4xf32>
      %133 = arith.divf %117, %132 : vector<1x4xf32>
      %134 = vector.shape_cast %133 : vector<1x4xf32> to vector<1x1x4xf32>
      %cst_66 = arith.constant dense<0.000000e+00> : vector<1xf32>
      %135 = vector.multi_reduction <add>, %134, %cst_66 [1, 2] : vector<1x1x4xf32> to vector<1xf32>
      %136 = vector.shape_cast %135 : vector<1xf32> to vector<1x1x1xf32>
      %137 = vector.extract %136[0, 0, 0] : f32 from vector<1x1x1xf32>
      %138 = vector.broadcast %137 : f32 to vector<1x4xf32>
      %cst_67 = arith.constant 0.000000e+00 : f32
      %139 = vector.broadcast %cst_67 : f32 to vector<2x4xf32>
      %140 = tpu.concatenate %80, %87, %93, %117, %132, %138, %139 in 0 : vector<1x4xf32>, vector<1x4xf32>, vector<1x4xf32>, vector<1x4xf32>, vector<1x4xf32>, vector<1x4xf32>, vector<2x4xf32> -> vector<8x4xf32>
      %c0_68 = arith.constant 0 : index
      %c0_69 = arith.constant 0 : index
      %141 = vector.load %arg4[%c0_68, %c0_69] : memref<8x4xf32, #tpu.memory_space<vmem>>, vector<8x4xf32>
      tpu.vector_store %arg4[%c0_68, %c0_69], %140 {strides = array<i32>} : memref<8x4xf32, #tpu.memory_space<vmem>>, vector<8x4xf32>,
    } else {
    }
    return
  }
  func.func @transform_0(%arg0: i32) -> (i32, i32) {
    %c0_i32 = arith.constant 0 : i32
    %c0_i32_0 = arith.constant 0 : i32
    return %arg0, %c0_i32 : i32, i32
  }
  func.func @transform_1(%arg0: i32) -> (i32, i32) {
    %c0_i32 = arith.constant 0 : i32
    %c0_i32_0 = arith.constant 0 : i32
    return %arg0, %c0_i32 : i32, i32
  }
  func.func @transform_2(%arg0: i32) -> (i32, i32) {
    %c0_i32 = arith.constant 0 : i32
    %c0_i32_0 = arith.constant 0 : i32
    %c0_i32_1 = arith.constant 0 : i32
    return %c0_i32, %c0_i32_0 : i32, i32
  }
  func.func @transform_3(%arg0: i32) -> (i32, i32) {
    %c0_i32 = arith.constant 0 : i32
    %c0_i32_0 = arith.constant 0 : i32
    %c0_i32_1 = arith.constant 0 : i32
    return %c0_i32, %c0_i32_0 : i32, i32
  }
}

</mosaic_0001>

<bundles_post_ra>
// kernel: tpu_custom_call.1
= control target key start
LH: loop header
LB: loop body
LE: loop exit
PB: predicated region body
PF: predicated region fallthrough
CT: control target
= control target key end

     0   :  { %vm18_vm0 = vcmask 24576   ;;  %v25_v0 = vlaneseq  ;;  %v323_v1 = vmov 0   ;;  %v324_v3 = vmov 0.0   ;;  %s428_s1 = inlined_call_operand.vmem [shape: s32[8,1], index: 1, kind: input, shape index: {}]   ;;  %s429_s0 = inlined_call_operand.vmem [shape: f32[8,4], index: 0, kind: input, shape index: {}]   ;;  %s430_s2 = inlined_call_operand.vmem [shape: f32[8,4], index: 2, kind: input, shape index: {}, may-alias: {2,3}]   ;;  %s431_s3 = inlined_call_operand.vmem [shape: f32[8,4], index: 3, kind: output, shape index: {}, may-alias: {2,3}]  }
   0x1   :  { %318 = vset.pattern.permute.xlu0 %v323_v1  ;;  %v43_v2 = vld [vmem:[%s428_s1] sm:$0xff]  ;;  %19 = vst.msk [vmem:[#allocation2] sm:$0x1] %vm18_vm0, %v324_v3  ;;  %20 = vst.msk [vmem:[#allocation3] sm:$0x1] %vm18_vm0, %v324_v3  ;;  %vm53_vm1 = vcmask 31744  }
   0x2   :  { %21 = vst.msk [vmem:[#allocation4] sm:$0x1] %vm18_vm0, %v324_v3  ;;  %22 = vst.msk [vmem:[#allocation5] sm:$0x1] %vm18_vm0, %v324_v3  ;;  %45 = vperm.xlu0 %318, %v43_v2   ;;  %v26_v4 = vshrl.u32 %v25_v0, 7  ;;  %v40_v10 = vld [vmem:[%s429_s0] sm:$0xff] }
   0x3   :  { %23 = vst.msk [vmem:[#allocation6] sm:$0x1] %vm18_vm0, %v324_v3  ;;  %24 = vst.msk [vmem:[#allocation7] sm:$0x1] %vm18_vm0, %v324_v3  ;;  %v125_v43 = vld [vmem:[%s430_s2] sm:$0xff]  ;;  %v42_v49 = vand.u32 127, %v25_v0 }
   0x4   :  { %v33_v5 = vsub.s32 7, %v26_v4  ;;  %v372_v41 = vsub.s32 0, %v26_v4  ;;  %v378_v44 = vmul.f32 0.43046722, %v125_v43  ;;  %v325_v46 = vmov 1966171168  }
   0x5   :  { %v163_v47 = vunpack.c.l.s4 %v325_v46  ;;  %vm295_vm3 = vcmask 1040384   ;;  %vm297_vm4 = vcmask 1041408   ;;  %vm299_vm5 = vcmask 1042432  }
   0x6   :  { %v34_v6 = vcvt.s32.f32 %v33_v5  ;;  %vm301_vm6 = vcmask 1043456   ;;  %vm303_vm7 = vcmask 1044480   ;;  %vm305_vm8 = vcmask 1045504  }
   0x7   :  { %v164_v50 = vunpack.c.0.s8 %v163_v47 }
   0x8   :  { %v35_v7 = vmax.f32 %v34_v6, 0.0  ;;  %v64_v32 = vld [vmem:[#allocation3] sm:$0x1] }
   0x9   :  { %v85_v36 = vld [vmem:[#allocation5] sm:$0x1]  ;;  %v394_v57 = vsub.s32 %v164_v50, %v26_v4 }
   0xa   :  { %v36_v8 = vmul.f32 -0.105360515, %v35_v7  ;;  %v107_v26 = vld [vmem:[#allocation7] sm:$0x1] }
   0xc   :  { %v37_v9 = vmul.f32 1.442695, %v36_v8 }
   0xe   :  { %319 = vpow2.f32 %v37_v9 }
  0x18   :  { %v320_v11 = vpop.eup %319 }
  0x19   :  { %v108_v12 = vrot.slane %v320_v11, 4  ;;  %v50_v13 = vmul.f32 %v320_v11, %v40_v10 }
  0x1b   :  { %v109_v14 = vadd.f32 %v320_v11, %v108_v12  ;;  %v65_v15 = vsel %vm53_vm1, %v50_v13, 0.0  ;;  %v86_v16 = vmul.f32 %v50_v13, %v40_v10 }
  0x1c   :  { %v66_v17 = vrot.slane %v65_v15, 4 }
  0x1d   :  { %v110_v18 = vrot.slane %v109_v14, 2  ;;  %v87_v19 = vsel %vm53_vm1, %v86_v16, 0.0 }
  0x1e   :  { %v67_v20 = vadd.f32 %v66_v17, %v65_v15  ;;  %v88_v21 = vrot.slane %v87_v19, 4 }
  0x1f   :  { %v111_v22 = vadd.f32 %v110_v18, %v109_v14 }
  0x20   :  { %v68_v23 = vrot.slane %v67_v20, 2  ;;  %v89_v24 = vadd.f32 %v88_v21, %v87_v19 }
  0x21   :  { %v112_v25 = vrot.slane %v111_v22, 1 }
  0x22   :  { %v69_v27 = vadd.f32 %v68_v23, %v67_v20  ;;  %v90_v28 = vrot.slane %v89_v24, 2  ;;  %v96_v23 = vld [vmem:[#allocation6] sm:$0x1] }
  0x23   :  { %v113_v29 = vadd.f32 %v112_v25, %v111_v22  ;;  %v52_v22 = vld [vmem:[#allocation2] sm:$0x1] }
  0x24   :  { %v70_v30 = vrot.slane %v69_v27, 1  ;;  %v91_v31 = vadd.f32 %v90_v28, %v89_v24  ;;  %v74_v28 = vld [vmem:[#allocation4] sm:$0x1] }
  0x25   :  { %v114_v33 = vadd.f32 %v113_v29, %v107_v26 }
  0x26   :  { %v71_v34 = vadd.f32 %v70_v30, %v69_v27  ;;  %v92_v35 = vrot.slane %v91_v31, 1 }
  0x27   :  { %115 = vst.msk [vmem:[#allocation7] sm:$0x1] %vm18_vm0, %v114_v33 }
  0x28   :  { %v72_v37 = vadd.f32 %v71_v34, %v64_v32  ;;  %v93_v38 = vadd.f32 %v92_v35, %v91_v31 }
  0x2a   :  { %73 = vst.msk [vmem:[#allocation3] sm:$0x1] %vm18_vm0, %v72_v37  ;;  %v94_v39 = vadd.f32 %v93_v38, %v85_v36 }
  0x2c   :  { %95 = vst.msk [vmem:[#allocation5] sm:$0x1] %vm18_vm0, %v94_v39 }
  0x2e   :  { %v385_v51 = vld [vmem:[#allocation7] sm:$0x1] }
  0x2f   :  { %v246_v56 = vrot.slane %v385_v51, %v372_v41 }
  0x31   :  { %v370_v40 = vld [vmem:[#allocation3] sm:$0x1] }
  0x32   :  { %v138_v42 = vmul.f32 0.1, %v370_v40  ;;  %v220_v53 = vrot.slane %v370_v40, %v372_v41 }
  0x33   :  { %v122_v27 = vld [vmem:[#allocation5] sm:$0x1] }
  0x34   :  { %v143_v45 = vrot.slane %v138_v42, %v372_v41 }
  0x36   :  { %v382_v48 = vadd.f32 %v143_v45, %v378_v44 }
  0x38   :  { %v215_v52 = vmul.f32 2.0, %v382_v48  ;;  %v241_v55 = vmul.f32 %v382_v48, %v382_v48 }
  0x3a   :  { %v222_v58 = vmul.f32 %v220_v53, %v215_v52  ;;  %v248_v62 = vmul.f32 %v246_v56, %v241_v55 }
  0x3c   :  { %v230_v2 = vrot.slane %v222_v58, %v394_v57 }
  0x3e   :  { %v237_v12 = vrot.slane %v230_v2, %v394_v57 }
  0x40   :  { %v238_v17 = vcombine.high %v237_v12, %v237_v12 }
  0x42   :  { %v240_v29 = vsub.f32 %v122_v27, %v238_v17 }
  0x81   :  { %v46_v54 = vpop.permute.xlu0 %45 }
  0x82   :  { %vm47_vm2 = vcmp.eq.s32.totalorder %v42_v49, %v46_v54 }
  0x83   :  { %v312_v59 = vsel %vm47_vm2, 1.0, %v324_v3  ;;  %v256_v3 = vrot.slane %v248_v62, %v394_v57 }
  0x84   :  { %v51_v60 = vmul.f32 %v312_v59, %v50_v13  ;;  %v97_v61 = vmul.f32 %v320_v11, %v312_v59 }
  0x85   :  { %v263_v18 = vrot.slane %v256_v3, %v394_v57 }
  0x86   :  { %v54_v63 = vsel %vm53_vm1, %v51_v60, 0.0  ;;  %v75_v0 = vmul.f32 %v51_v60, %v40_v10  ;;  %v98_v1 = vsel %vm53_vm1, %v97_v61, 0.0 }
  0x87   :  { %v55_v5 = vrot.slane %v54_v63, 4  ;;  %v99_v6 = vrot.slane %v98_v1, 4  ;;  %v264_v30 = vcombine.high %v263_v18, %v263_v18 }
  0x88   :  { %v76_v7 = vsel %vm53_vm1, %v75_v0, 0.0 }
  0x89   :  { %v56_v4 = vadd.f32 %v55_v5, %v54_v63  ;;  %v77_v8 = vrot.slane %v76_v7, 4  ;;  %v100_v9 = vadd.f32 %v99_v6, %v98_v1  ;;  %v266_v35 = vadd.f32 %v264_v30, %v240_v29 }
  0x8b   :  { %v57_v11 = vrot.slane %v56_v4, 2  ;;  %v78_v13 = vadd.f32 %v77_v8, %v76_v7  ;;  %v101_v14 = vrot.slane %v100_v9, 2  ;;  %v267_v36 = vmul.f32 0.1, %v266_v35 }
  0x8d   :  { %v58_v15 = vadd.f32 %v57_v11, %v56_v4  ;;  %v79_v10 = vrot.slane %v78_v13, 2  ;;  %v102_v16 = vadd.f32 %v101_v14, %v100_v9  ;;  %v272_v43 = vrot.slane %v267_v36, %v372_v41 }
  0x8f   :  { %v59_v19 = vrot.slane %v58_v15, 1  ;;  %v80_v20 = vadd.f32 %v79_v10, %v78_v13  ;;  %v103_v21 = vrot.slane %v102_v16, 1  ;;  %v274_v50 = vadd.f32 %v272_v43, %v378_v44 }
  0x91   :  { %v60_v24 = vadd.f32 %v59_v19, %v58_v15  ;;  %v81_v25 = vrot.slane %v80_v20, 1  ;;  %v104_v26 = vadd.f32 %v103_v21, %v102_v16  ;;  %v275_v59 = vmax.f32 %v274_v50, 1e-08 }
  0x93   :  { %v61_v31 = vadd.f32 %v60_v24, %v52_v22  ;;  %v82_v32 = vadd.f32 %v81_v25, %v80_v20  ;;  %v105_v33 = vadd.f32 %v104_v26, %v96_v23  ;;  %v277_v1 = vrot.slane %v275_v59, 1 }
  0x95   :  { %63 = vst.msk [vmem:[#allocation2] sm:$0x1] %vm18_vm0, %v61_v31  ;;  %v83_v34 = vadd.f32 %v82_v32, %v74_v28  ;;  %106 = vst.msk [vmem:[#allocation6] sm:$0x1] %vm18_vm0, %v105_v33  ;;  %321 = vrcp.f32 %v277_v1 }
  0x97   :  { %84 = vst.msk [vmem:[#allocation4] sm:$0x1] %vm18_vm0, %v83_v34 }
  0x9c   :  { %v119_v37 = vld [vmem:[#allocation2] sm:$0x1]  ;;  %v123_v38 = vld [vmem:[#allocation6] sm:$0x1] }
  0x9d   :  { %v127_v39 = vmul.f32 0.1, %v119_v37  ;;  %v129_v42 = vsub.f32 %v370_v40, %v119_v37  ;;  %v180_v46 = vsub.f32 %v385_v51, %v123_v38 }
  0x9e   :  { %v121_v0 = vld [vmem:[#allocation4] sm:$0x1] }
  0x9f   :  { %v130_v45 = vmul.f32 0.1, %v129_v42  ;;  %v128_v47 = vadd.f32 %v127_v39, %v378_v44  ;;  %v158_v53 = vrot.slane %v129_v42, %v372_v41  ;;  %v185_v54 = vrot.slane %v180_v46, %v372_v41  ;;  %v322_v16 = vpop.eup %321 }
  0xa0   :  { %v152_v4 = vsub.f32 %v122_v27, %v121_v0 }
  0xa1   :  { %v135_v49 = vrot.slane %v130_v45, %v372_v41  ;;  %v146_v55 = vmul.f32 2.0, %v128_v47  ;;  %v149_v2 = vmul.f32 %v128_v47, %v128_v47 }
  0xa3   :  { %v137_v52 = vadd.f32 %v135_v49, %v378_v44  ;;  %v147_v61 = vmul.f32 %v146_v55, %v119_v37  ;;  %v150_v9 = vmul.f32 %v149_v2, %v123_v38 }
  0xa5   :  { %v153_v40 = vmul.f32 2.0, %v137_v52  ;;  %v179_v56 = vmul.f32 %v137_v52, %v137_v52  ;;  %v296_v58 = vsel %vm295_vm3, %v128_v47, %v137_v52  ;;  %v148_v7 = vsub.f32 %v121_v0, %v147_v61 }
  0xa6   :  { %v298_v18 = vsel %vm297_vm4, %v296_v58, %v382_v48 }
  0xa7   :  { %v160_v60 = vmul.f32 %v158_v53, %v153_v40  ;;  %v187_v51 = vmul.f32 %v185_v54, %v179_v56  ;;  %v151_v11 = vadd.f32 %v150_v9, %v148_v7 }
  0xa9   :  { %v168_v62 = vrot.slane %v160_v60, %v394_v57  ;;  %v195_v63 = vrot.slane %v187_v51, %v394_v57 }
  0xab   :  { %v169_v5 = vcombine.high %v168_v62, %v168_v62  ;;  %v196_v6 = vcombine.high %v195_v63, %v195_v63 }
  0xad   :  { %v176_v8 = vrot.slane %v169_v5, %v394_v57  ;;  %v203_v3 = vrot.slane %v196_v6, %v394_v57 }
  0xaf   :  { %v178_v12 = vsub.f32 %v152_v4, %v176_v8 }
  0xb1   :  { %v205_v13 = vadd.f32 %v203_v3, %v178_v12 }
  0xb3   :  { %v206_v14 = vadd.f32 %v205_v13, %v151_v11 }
  0xb5   :  { %v207_v15 = vmul.f32 0.1, %v206_v14 }
  0xb7   :  { %v212_v10 = vrot.slane %v207_v15, %v372_v41 }
  0xb9   :  { %v214_v17 = vadd.f32 %v212_v10, %v378_v44 }
  0xbb   :  { %v280_v19 = vmul.f32 %v322_v16, %v214_v17  ;;  %v300_v20 = vsel %vm299_vm5, %v298_v18, %v214_v17 }
  0xbc   :  { %v302_v48 = vsel %vm301_vm6, %v300_v20, %v275_v59 }
  0xbd   :  { %v282_v21 = vrot.slane %v280_v19, 3 }
  0xbf   :  { %v284_v22 = vsel %vm18_vm0, %v282_v21, 0.0 }
  0xc0   :  { %285 = vadd.xlane.f32.xlu0 %v284_v22 }
 0x14d   :  { %v286_v57 = vpop.xlane.xlu0 %285 }
 0x14e   :  { %v287_v23 = vrot.slane %v286_v57, 4 }
 0x150   :  { %v288_v24 = vadd.f32 %v287_v23, %v286_v57 }
 0x152   :  { %v289_v25 = vrot.slane %v288_v24, 2 }
 0x154   :  { %v290_v26 = vadd.f32 %v289_v25, %v288_v24 }
 0x156   :  { %v291_v27 = vrot.slane %v290_v26, 1 }
 0x158   :  { %v292_v41 = vadd.f32 %v291_v27, %v290_v26 }
 0x15a   :  { %313 = vpush %v292_v41 }
 0x18b   :  { %s314_s2 = spop %313 }
 0x18c   :  { %v294_v44 = vstv %s314_s2 }
 0x18d   :  { %v304_v28 = vsel %vm303_vm7, %v302_v48, %v294_v44 }
 0x18e   :  { %v306_v29 = vsel %vm305_vm8, %v304_v28, 0.0 }
 0x18f   :  { %307 = vst.msk [vmem:[%s431_s3] sm:$0xff] %vm53_vm1, %v306_v29 }

</bundles_post_ra>
